<compile_context>
chip_gen: v6e
topology: v6e:2x2x1
jax: 0.10.0
libtpu: 0.0.40
codegen_flags: <defaults>
</compile_context>

<pallas_src>
import functools
import numpy as np
import jax
import jax.numpy as jnp
from jax.experimental import pallas as pl
from jax.experimental.pallas import tpu as pltpu


def _drb_kernel(num_layers, t_len,
                x_ref, w_in_ref, b_in_ref, wd_ref, bd_ref, w1_ref, b1_ref,
                w_out_ref, b_out_ref, o_ref):
    rows = x_ref.shape[0]                      # = batches_per_block * t_len (static)

    # --- conv_1x1 (Cin -> F): pointwise conv == matmul over channels ----------------
    out = jnp.dot(x_ref[...], w_in_ref[...],
                  preferred_element_type=jnp.float32) + b_in_ref[...]   # (rows, F) f32
    fdim = out.shape[1]

    # time index of each row inside its batch (rows are batch-major, time-minor)
    t_idx = jax.lax.broadcasted_iota(jnp.int32, (rows, fdim), 0) % t_len

    # --- stack of DilatedResidualLayer, dilation = 2**l ------------------------------
    for l in range(num_layers):
        d = 2 ** l
        d_mod = d % rows
        # shifted copies of the residual stream via XLU sublane rolls; rows that would
        # read across a batch boundary / clip edge are zeroed with a VPU select.
        prev = jnp.where(t_idx >= d,
                         pltpu.roll(out, shift=d_mod, axis=0), 0.0)            # x[t-d]
        nxt = jnp.where(t_idx < t_len - d,
                        pltpu.roll(out, shift=(rows - d_mod) % rows, axis=0), 0.0)  # x[t+d]
        out_b = out.astype(jnp.bfloat16)        # single bf16 copy, reused as center tap
        # dilated k=3 conv: three shallow MXU dots, f32 accumulation (no lane concat)
        h = (jnp.dot(prev.astype(jnp.bfloat16), wd_ref[3 * l + 0],
                     preferred_element_type=jnp.float32)
             + jnp.dot(out_b, wd_ref[3 * l + 1],
                       preferred_element_type=jnp.float32)
             + jnp.dot(nxt.astype(jnp.bfloat16), wd_ref[3 * l + 2],
                       preferred_element_type=jnp.float32)
             + bd_ref[l])
        h = jnp.maximum(h, 0.0)                                                # ReLU
        h = jnp.dot(h.astype(jnp.bfloat16), w1_ref[l],
                    preferred_element_type=jnp.float32) + b1_ref[l]
        out = out + h                                                          # residual (f32)

    # --- conv_out (F -> Cout, zero-padded to a lane-dense width), bf16 writeback -----
    y = jnp.dot(out.astype(jnp.bfloat16), w_out_ref[...],
                preferred_element_type=jnp.float32) + b_out_ref[...]
    o_ref[...] = y.astype(o_ref.dtype)


def _round_up(x, m):
    return ((x + m - 1) // m) * m


def _pick_batches_per_block(n, t, target_rows=512):
    """Fold batches into one (rows, C) block, but keep >=2 grid steps when N >= 2
    (v7x has 2 TensorCores and shards 'parallel' grid axes across them)."""
    cap = max(1, target_rows // max(t, 1))
    if n >= 2:
        cap = min(cap, n // 2)              # guarantee at least 2 parallel grid steps
    nb = max(1, min(n, cap))
    while n % nb:                           # nb must evenly divide the batch
        nb -= 1
    if nb < n and (nb * t) % 8 != 0:        # partial row-blocks must be sublane (8) aligned
        nb = n
    return nb


def _vmem_limit_bytes(rows_blk, cin, f, cout_pad, num_layers):
    """Explicit scoped-VMEM budget from the actual block shapes (2x headroom)."""
    weights = ((cin * f + 4 * num_layers * f * f + f * cout_pad) * 2     # bf16 weights
               + (f * (2 * num_layers + 1) + cout_pad) * 4)              # f32 biases
    streams = 2 * rows_blk * cin * 2 + 2 * rows_blk * cout_pad * 2       # double-buffered I/O
    live = rows_blk * f * 4 * 6                                          # f32 residual/taps/h
    est = 2 * weights + streams + live
    return int(min(64 * 1024 * 1024, max(2 * est, 4 * 1024 * 1024)))


def drb_forward(x_nct, params, num_layers):
    """x_nct: (N, Cin, T) like PyTorch Conv1d input.  Returns (N, Cout, T) float32."""
    N, Cin, T = x_nct.shape
    F = params["w_in"].shape[1]
    Cout = params["w_out"].shape[1]
    Cout_pad = _round_up(Cout, 128)                       # lane-dense output store
    L = num_layers

    # (batch, time) flattened onto sublanes; channels on lanes
    x_rows = jnp.transpose(x_nct, (0, 2, 1)).reshape(N * T, Cin).astype(jnp.bfloat16)

    # weights pre-packed for the kernel: bf16 matmul operands, f32 biases
    w_in = params["w_in"].astype(jnp.bfloat16)                       # (Cin, F)
    b_in = params["b_in"].astype(jnp.float32)                        # (1, F)
    wd = params["wd"].reshape(3 * L, F, F).astype(jnp.bfloat16)      # (3L, F, F) per-tap
    bd = params["bd"].astype(jnp.float32)                            # (L, 1, F)
    w1 = params["w1"].astype(jnp.bfloat16)                           # (L, F, F)
    b1 = params["b1"].astype(jnp.float32)                            # (L, 1, F)
    w_out = jnp.zeros((F, Cout_pad), jnp.bfloat16).at[:, :Cout].set(
        params["w_out"].astype(jnp.bfloat16))                        # (F, Cout_pad)
    b_out = jnp.zeros((1, Cout_pad), jnp.float32).at[:, :Cout].set(
        params["b_out"].astype(jnp.float32))                         # (1, Cout_pad)

    nb = _pick_batches_per_block(N, T)
    rows_blk = nb * T
    grid = (N // nb,)
    vmem_limit = _vmem_limit_bytes(rows_blk, Cin, F, Cout_pad, L)

    kernel = functools.partial(_drb_kernel, num_layers, T)
    out = pl.pallas_call(
        kernel,
        out_shape=jax.ShapeDtypeStruct((N * T, Cout_pad), jnp.bfloat16),
        grid=grid,
        in_specs=[
            pl.BlockSpec((rows_blk, Cin), lambda i: (i, 0)),          # activations
            pl.BlockSpec((Cin, F), lambda i: (0, 0)),                 # conv_1x1 weight
            pl.BlockSpec((1, F), lambda i: (0, 0)),                   # conv_1x1 bias
            pl.BlockSpec((3 * L, F, F), lambda i: (0, 0, 0)),         # dilated per-tap weights
            pl.BlockSpec((L, 1, F), lambda i: (0, 0, 0)),             # dilated biases
            pl.BlockSpec((L, F, F), lambda i: (0, 0, 0)),             # per-layer 1x1 weights
            pl.BlockSpec((L, 1, F), lambda i: (0, 0, 0)),             # per-layer 1x1 biases
            pl.BlockSpec((F, Cout_pad), lambda i: (0, 0)),            # conv_out weight (padded)
            pl.BlockSpec((1, Cout_pad), lambda i: (0, 0)),            # conv_out bias (padded)
        ],
        out_specs=pl.BlockSpec((rows_blk, Cout_pad), lambda i: (i, 0)),
        compiler_params=pltpu.CompilerParams(
            dimension_semantics=("parallel",),
            vmem_limit_bytes=vmem_limit),
    )(x_rows, w_in, b_in, wd, bd, w1, b1, w_out, b_out)

    y = out.reshape(N, T, Cout_pad)[:, :, :Cout].astype(jnp.float32)
    return jnp.transpose(y, (0, 2, 1))                                # (N, Cout, T)


def drb_reference(x_nct, params, num_layers):
    """Pure-JAX reference with PyTorch Conv1d semantics, using the same bf16-operand /
    f32-accumulate / bf16-writeback precision policy as the kernel (the PyTorch module
    runs under amp autocast anyway)."""
    f32 = jnp.float32
    rb = lambda a: a.astype(jnp.bfloat16).astype(f32)     # round-to-bf16 helper
    x = jnp.transpose(x_nct, (0, 2, 1)).astype(f32)       # (N, T, Cin)
    out = jnp.einsum("ntc,cf->ntf", rb(x), rb(params["w_in"])) + params["b_in"]
    T = out.shape[1]
    for l in range(num_layers):
        d = 2 ** l
        w0, wc, w2 = (rb(params["wd"][l, k]) for k in range(3))
        prev = jnp.pad(out, ((0, 0), (d, 0), (0, 0)))[:, :T]
        nxt = jnp.pad(out, ((0, 0), (0, d), (0, 0)))[:, d:]
        h = (jnp.einsum("ntf,fg->ntg", rb(prev), w0)
             + jnp.einsum("ntf,fg->ntg", rb(out), wc)
             + jnp.einsum("ntf,fg->ntg", rb(nxt), w2)
             + params["bd"][l])
        h = jnp.maximum(h, 0.0)
        h = jnp.einsum("ntf,fg->ntg", rb(h), rb(params["w1"][l])) + params["b1"][l]
        out = out + h
    y = jnp.einsum("ntf,fo->nto", rb(out), rb(params["w_out"])) + params["b_out"]
    return jnp.transpose(rb(y), (0, 2, 1))                # kernel stores bf16 too


def init_params(key, num_layers, num_f_maps, in_channels, out_channels):
    """Deterministic synthetic weights.  Conv1d weights (Cout, Cin, k) are stored
    pre-transposed as (Cin, Cout) matmul matrices (one per kernel tap)."""
    ks = jax.random.split(key, 9)
    s = 0.1
    return {
        "w_in": s * jax.random.normal(ks[0], (in_channels, num_f_maps), jnp.float32),
        "b_in": s * jax.random.normal(ks[1], (1, num_f_maps), jnp.float32),
        "wd": s * jax.random.normal(ks[2], (num_layers, 3, num_f_maps, num_f_maps), jnp.float32),
        "bd": s * jax.random.normal(ks[3], (num_layers, 1, num_f_maps), jnp.float32),
        "w1": s * jax.random.normal(ks[4], (num_layers, num_f_maps, num_f_maps), jnp.float32),
        "b1": s * jax.random.normal(ks[5], (num_layers, 1, num_f_maps), jnp.float32),
        "w_out": s * jax.random.normal(ks[6], (num_f_maps, out_channels), jnp.float32),
        "b_out": s * jax.random.normal(ks[7], (1, out_channels), jnp.float32),
    }


if __name__ == "__main__":
    key = jax.random.PRNGKey(0)
    kx, kp = jax.random.split(key)

    # DRB(num_layers=3, num_f_maps=32, in_channels=4, out_channels=8), x: (N=2, Cin=4, T=16)
    N, Cin, T = 2, 4, 16
    num_layers, F, Cout = 3, 32, 8

    x = jax.random.normal(kx, (N, Cin, T), jnp.float32)
    params = init_params(kp, num_layers, F, Cin, Cout)

    y = drb_forward(x, params, num_layers)
    y = jax.block_until_ready(y)
    assert y.shape == (N, Cout, T)

    y_ref = drb_reference(x, params, num_layers)
    np.testing.assert_allclose(np.asarray(y), np.asarray(y_ref), rtol=1e-2, atol=1e-2)

    print("KERNEL_OK")
</pallas_src>

<mosaic_0001>
module attributes {stable_mosaic.version = 11 : i64} {
  func.func @_drb_kernel(%arg0: i32, %arg1: memref<16x4xbf16, #tpu.memory_space<vmem>>, %arg2: memref<4x32xbf16, #tpu.memory_space<vmem>>, %arg3: memref<1x32xf32, #tpu.memory_space<vmem>>, %arg4: memref<9x32x32xbf16, #tpu.memory_space<vmem>>, %arg5: memref<3x1x32xf32, #tpu.memory_space<vmem>>, %arg6: memref<3x32x32xbf16, #tpu.memory_space<vmem>>, %arg7: memref<3x1x32xf32, #tpu.memory_space<vmem>>, %arg8: memref<32x128xbf16, #tpu.memory_space<vmem>>, %arg9: memref<1x128xf32, #tpu.memory_space<vmem>>, %arg10: memref<16x128xbf16, #tpu.memory_space<vmem>>) attributes {dimension_semantics = [#tpu.dimension_semantics<parallel>], iteration_bounds = array<i64: 2>, scalar_prefetch = 0 : i64, scratch_operands = 0 : i64, tpu.core_type = #tpu.core_type<tc>, window_params = [{transform_indices = @transform_0, window_bounds = array<i64: 16, 4>}, {pipeline_mode = #tpu.pipeline_mode<synchronous>, transform_indices = @transform_1, window_bounds = array<i64: 4, 32>}, {pipeline_mode = #tpu.pipeline_mode<synchronous>, transform_indices = @transform_2, window_bounds = array<i64: 1, 32>}, {pipeline_mode = #tpu.pipeline_mode<synchronous>, transform_indices = @transform_3, window_bounds = array<i64: 9, 32, 32>}, {pipeline_mode = #tpu.pipeline_mode<synchronous>, transform_indices = @transform_4, window_bounds = array<i64: 3, 1, 32>}, {pipeline_mode = #tpu.pipeline_mode<synchronous>, transform_indices = @transform_5, window_bounds = array<i64: 3, 32, 32>}, {pipeline_mode = #tpu.pipeline_mode<synchronous>, transform_indices = @transform_6, window_bounds = array<i64: 3, 1, 32>}, {pipeline_mode = #tpu.pipeline_mode<synchronous>, transform_indices = @transform_7, window_bounds = array<i64: 32, 128>}, {pipeline_mode = #tpu.pipeline_mode<synchronous>, transform_indices = @transform_8, window_bounds = array<i64: 1, 128>}, {transform_indices = @transform_9, window_bounds = array<i64: 16, 128>}]} {
    %c0 = arith.constant 0 : index
    %c0_0 = arith.constant 0 : index
    %0 = vector.load %arg1[%c0, %c0_0] : memref<16x4xbf16, #tpu.memory_space<vmem>>, vector<16x4xbf16>
    %c0_1 = arith.constant 0 : index
    %c0_2 = arith.constant 0 : index
    %1 = vector.load %arg2[%c0_1, %c0_2] : memref<4x32xbf16, #tpu.memory_space<vmem>>, vector<4x32xbf16>
    %cst = arith.constant dense<0.000000e+00> : vector<16x32xf32>
    %2 = tpu.matmul %0, %1, %cst {dimension_numbers = #tpu.dot_dimension_numbers<[1], [0], [0], [1], [0, 0, 1, 1], [], []>} : vector<16x4xbf16>, vector<4x32xbf16>, vector<16x32xf32> -> vector<16x32xf32>
    %c0_3 = arith.constant 0 : index
    %c0_4 = arith.constant 0 : index
    %3 = vector.load %arg3[%c0_3, %c0_4] : memref<1x32xf32, #tpu.memory_space<vmem>>, vector<1x32xf32>
    %4 = vector.broadcast %3 : vector<1x32xf32> to vector<16x32xf32>
    %5 = arith.addf %2, %4 : vector<16x32xf32>
    %6 = tpu.iota {dimensions = array<i32: 0>} : vector<16x32xi32>
    %c16_i32 = arith.constant 16 : i32
    %c0_i32 = arith.constant 0 : i32
    %7 = arith.cmpi eq, %c16_i32, %c0_i32 : i32
    %c1_i32 = arith.constant 1 : i32
    %8 = arith.select %7, %c1_i32, %c16_i32 : i32
    %9 = vector.broadcast %8 : i32 to vector<16x32xi32>
    %10 = arith.remsi %6, %9 : vector<16x32xi32>
    %c0_i32_5 = arith.constant 0 : i32
    %11 = vector.broadcast %c0_i32_5 : i32 to vector<16x32xi32>
    %12 = arith.cmpi ne, %10, %11 : vector<16x32xi32>
    %c0_i32_6 = arith.constant 0 : i32
    %13 = vector.broadcast %c0_i32_6 : i32 to vector<16x32xi32>
    %14 = arith.cmpi slt, %10, %13 : vector<16x32xi32>
    %c0_i32_7 = arith.constant 0 : i32
    %15 = arith.cmpi slt, %8, %c0_i32_7 : i32
    %16 = vector.broadcast %15 : i1 to vector<16x32xi1>
    %17 = vector.broadcast %16 : vector<16x32xi1> to vector<16x32xi1>
    %18 = arith.xori %14, %17 : vector<16x32xi1>
    %19 = arith.andi %18, %12 : vector<16x32xi1>
    %20 = vector.broadcast %8 : i32 to vector<16x32xi32>
    %21 = arith.addi %10, %20 : vector<16x32xi32>
    %22 = arith.select %19, %21, %10 : vector<16x32xi1>, vector<16x32xi32>
    %c1_i32_8 = arith.constant 1 : i32
    %23 = vector.broadcast %c1_i32_8 : i32 to vector<16x32xi32>
    %24 = arith.cmpi sge, %22, %23 : vector<16x32xi32>
    %c1_i32_9 = arith.constant 1 : i32
    %25 = tpu.dynamic_rotate %5 by %c1_i32_9 dim 0 : vector<16x32xf32>, i32 -> vector<16x32xf32>
    %cst_10 = arith.constant 0.000000e+00 : f32
    %26 = vector.broadcast %cst_10 : f32 to vector<16x32xf32>
    %27 = arith.select %24, %25, %26 : vector<16x32xi1>, vector<16x32xf32>
    %c15_i32 = arith.constant 15 : i32
    %28 = vector.broadcast %c15_i32 : i32 to vector<16x32xi32>
    %29 = arith.cmpi slt, %22, %28 : vector<16x32xi32>
    %c15_i32_11 = arith.constant 15 : i32
    %30 = tpu.dynamic_rotate %5 by %c15_i32_11 dim 0 : vector<16x32xf32>, i32 -> vector<16x32xf32>
    %cst_12 = arith.constant 0.000000e+00 : f32
    %31 = vector.broadcast %cst_12 : f32 to vector<16x32xf32>
    %32 = arith.select %29, %30, %31 : vector<16x32xi1>, vector<16x32xf32>
    %33 = arith.truncf %5 : vector<16x32xf32> to vector<16x32xbf16>
    %34 = arith.truncf %27 : vector<16x32xf32> to vector<16x32xbf16>
    %c0_13 = arith.constant 0 : index
    %c0_14 = arith.constant 0 : index
    %c0_15 = arith.constant 0 : index
    %35 = vector.load %arg4[%c0_13, %c0_14, %c0_15] : memref<9x32x32xbf16, #tpu.memory_space<vmem>>, vector<1x32x32xbf16>
    %36 = vector.shape_cast %35 : vector<1x32x32xbf16> to vector<32x32xbf16>
    %cst_16 = arith.constant dense<0.000000e+00> : vector<16x32xf32>
    %37 = tpu.matmul %34, %36, %cst_16 {dimension_numbers = #tpu.dot_dimension_numbers<[1], [0], [0], [1], [0, 0, 1, 1], [], []>} : vector<16x32xbf16>, vector<32x32xbf16>, vector<16x32xf32> -> vector<16x32xf32>
    %c1 = arith.constant 1 : index
    %c0_17 = arith.constant 0 : index
    %c0_18 = arith.constant 0 : index
    %38 = vector.load %arg4[%c1, %c0_17, %c0_18] : memref<9x32x32xbf16, #tpu.memory_space<vmem>>, vector<1x32x32xbf16>
    %39 = vector.shape_cast %38 : vector<1x32x32xbf16> to vector<32x32xbf16>
    %cst_19 = arith.constant dense<0.000000e+00> : vector<16x32xf32>
    %40 = tpu.matmul %33, %39, %cst_19 {dimension_numbers = #tpu.dot_dimension_numbers<[1], [0], [0], [1], [0, 0, 1, 1], [], []>} : vector<16x32xbf16>, vector<32x32xbf16>, vector<16x32xf32> -> vector<16x32xf32>
    %41 = arith.addf %37, %40 : vector<16x32xf32>
    %42 = arith.truncf %32 : vector<16x32xf32> to vector<16x32xbf16>
    %c2 = arith.constant 2 : index
    %c0_20 = arith.constant 0 : index
    %c0_21 = arith.constant 0 : index
    %43 = vector.load %arg4[%c2, %c0_20, %c0_21] : memref<9x32x32xbf16, #tpu.memory_space<vmem>>, vector<1x32x32xbf16>
    %44 = vector.shape_cast %43 : vector<1x32x32xbf16> to vector<32x32xbf16>
    %cst_22 = arith.constant dense<0.000000e+00> : vector<16x32xf32>
    %45 = tpu.matmul %42, %44, %cst_22 {dimension_numbers = #tpu.dot_dimension_numbers<[1], [0], [0], [1], [0, 0, 1, 1], [], []>} : vector<16x32xbf16>, vector<32x32xbf16>, vector<16x32xf32> -> vector<16x32xf32>
    %46 = arith.addf %41, %45 : vector<16x32xf32>
    %c0_23 = arith.constant 0 : index
    %c0_24 = arith.constant 0 : index
    %c0_25 = arith.constant 0 : index
    %47 = vector.load %arg5[%c0_23, %c0_24, %c0_25] : memref<3x1x32xf32, #tpu.memory_space<vmem>>, vector<1x1x32xf32>
    %48 = vector.shape_cast %47 : vector<1x1x32xf32> to vector<1x32xf32>
    %49 = vector.broadcast %48 : vector<1x32xf32> to vector<16x32xf32>
    %50 = arith.addf %46, %49 : vector<16x32xf32>
    %cst_26 = arith.constant 0.000000e+00 : f32
    %51 = vector.broadcast %cst_26 : f32 to vector<16x32xf32>
    %52 = arith.maximumf %50, %51 : vector<16x32xf32>
    %53 = arith.truncf %52 : vector<16x32xf32> to vector<16x32xbf16>
    %c0_27 = arith.constant 0 : index
    %c0_28 = arith.constant 0 : index
    %c0_29 = arith.constant 0 : index
    %54 = vector.load %arg6[%c0_27, %c0_28, %c0_29] : memref<3x32x32xbf16, #tpu.memory_space<vmem>>, vector<1x32x32xbf16>
    %55 = vector.shape_cast %54 : vector<1x32x32xbf16> to vector<32x32xbf16>
    %cst_30 = arith.constant dense<0.000000e+00> : vector<16x32xf32>
    %56 = tpu.matmul %53, %55, %cst_30 {dimension_numbers = #tpu.dot_dimension_numbers<[1], [0], [0], [1], [0, 0, 1, 1], [], []>} : vector<16x32xbf16>, vector<32x32xbf16>, vector<16x32xf32> -> vector<16x32xf32>
    %c0_31 = arith.constant 0 : index
    %c0_32 = arith.constant 0 : index
    %c0_33 = arith.constant 0 : index
    %57 = vector.load %arg7[%c0_31, %c0_32, %c0_33] : memref<3x1x32xf32, #tpu.memory_space<vmem>>, vector<1x1x32xf32>
    %58 = vector.shape_cast %57 : vector<1x1x32xf32> to vector<1x32xf32>
    %59 = vector.broadcast %58 : vector<1x32xf32> to vector<16x32xf32>
    %60 = arith.addf %56, %59 : vector<16x32xf32>
    %61 = arith.addf %5, %60 : vector<16x32xf32>
    %c2_i32 = arith.constant 2 : i32
    %62 = vector.broadcast %c2_i32 : i32 to vector<16x32xi32>
    %63 = arith.cmpi sge, %22, %62 : vector<16x32xi32>
    %c2_i32_34 = arith.constant 2 : i32
    %64 = tpu.dynamic_rotate %61 by %c2_i32_34 dim 0 : vector<16x32xf32>, i32 -> vector<16x32xf32>
    %cst_35 = arith.constant 0.000000e+00 : f32
    %65 = vector.broadcast %cst_35 : f32 to vector<16x32xf32>
    %66 = arith.select %63, %64, %65 : vector<16x32xi1>, vector<16x32xf32>
    %c14_i32 = arith.constant 14 : i32
    %67 = vector.broadcast %c14_i32 : i32 to vector<16x32xi32>
    %68 = arith.cmpi slt, %22, %67 : vector<16x32xi32>
    %c14_i32_36 = arith.constant 14 : i32
    %69 = tpu.dynamic_rotate %61 by %c14_i32_36 dim 0 : vector<16x32xf32>, i32 -> vector<16x32xf32>
    %cst_37 = arith.constant 0.000000e+00 : f32
    %70 = vector.broadcast %cst_37 : f32 to vector<16x32xf32>
    %71 = arith.select %68, %69, %70 : vector<16x32xi1>, vector<16x32xf32>
    %72 = arith.truncf %61 : vector<16x32xf32> to vector<16x32xbf16>
    %73 = arith.truncf %66 : vector<16x32xf32> to vector<16x32xbf16>
    %c3 = arith.constant 3 : index
    %c0_38 = arith.constant 0 : index
    %c0_39 = arith.constant 0 : index
    %74 = vector.load %arg4[%c3, %c0_38, %c0_39] : memref<9x32x32xbf16, #tpu.memory_space<vmem>>, vector<1x32x32xbf16>
    %75 = vector.shape_cast %74 : vector<1x32x32xbf16> to vector<32x32xbf16>
    %cst_40 = arith.constant dense<0.000000e+00> : vector<16x32xf32>
    %76 = tpu.matmul %73, %75, %cst_40 {dimension_numbers = #tpu.dot_dimension_numbers<[1], [0], [0], [1], [0, 0, 1, 1], [], []>} : vector<16x32xbf16>, vector<32x32xbf16>, vector<16x32xf32> -> vector<16x32xf32>
    %c4 = arith.constant 4 : index
    %c0_41 = arith.constant 0 : index
    %c0_42 = arith.constant 0 : index
    %77 = vector.load %arg4[%c4, %c0_41, %c0_42] : memref<9x32x32xbf16, #tpu.memory_space<vmem>>, vector<1x32x32xbf16>
    %78 = vector.shape_cast %77 : vector<1x32x32xbf16> to vector<32x32xbf16>
    %cst_43 = arith.constant dense<0.000000e+00> : vector<16x32xf32>
    %79 = tpu.matmul %72, %78, %cst_43 {dimension_numbers = #tpu.dot_dimension_numbers<[1], [0], [0], [1], [0, 0, 1, 1], [], []>} : vector<16x32xbf16>, vector<32x32xbf16>, vector<16x32xf32> -> vector<16x32xf32>
    %80 = arith.addf %76, %79 : vector<16x32xf32>
    %81 = arith.truncf %71 : vector<16x32xf32> to vector<16x32xbf16>
    %c5 = arith.constant 5 : index
    %c0_44 = arith.constant 0 : index
    %c0_45 = arith.constant 0 : index
    %82 = vector.load %arg4[%c5, %c0_44, %c0_45] : memref<9x32x32xbf16, #tpu.memory_space<vmem>>, vector<1x32x32xbf16>
    %83 = vector.shape_cast %82 : vector<1x32x32xbf16> to vector<32x32xbf16>
    %cst_46 = arith.constant dense<0.000000e+00> : vector<16x32xf32>
    %84 = tpu.matmul %81, %83, %cst_46 {dimension_numbers = #tpu.dot_dimension_numbers<[1], [0], [0], [1], [0, 0, 1, 1], [], []>} : vector<16x32xbf16>, vector<32x32xbf16>, vector<16x32xf32> -> vector<16x32xf32>
    %85 = arith.addf %80, %84 : vector<16x32xf32>
    %c1_47 = arith.constant 1 : index
    %c0_48 = arith.constant 0 : index
    %c0_49 = arith.constant 0 : index
    %86 = vector.load %arg5[%c1_47, %c0_48, %c0_49] : memref<3x1x32xf32, #tpu.memory_space<vmem>>, vector<1x1x32xf32>
    %87 = vector.shape_cast %86 : vector<1x1x32xf32> to vector<1x32xf32>
    %88 = vector.broadcast %87 : vector<1x32xf32> to vector<16x32xf32>
    %89 = arith.addf %85, %88 : vector<16x32xf32>
    %cst_50 = arith.constant 0.000000e+00 : f32
    %90 = vector.broadcast %cst_50 : f32 to vector<16x32xf32>
    %91 = arith.maximumf %89, %90 : vector<16x32xf32>
    %92 = arith.truncf %91 : vector<16x32xf32> to vector<16x32xbf16>
    %c1_51 = arith.constant 1 : index
    %c0_52 = arith.constant 0 : index
    %c0_53 = arith.constant 0 : index
    %93 = vector.load %arg6[%c1_51, %c0_52, %c0_53] : memref<3x32x32xbf16, #tpu.memory_space<vmem>>, vector<1x32x32xbf16>
    %94 = vector.shape_cast %93 : vector<1x32x32xbf16> to vector<32x32xbf16>
    %cst_54 = arith.constant dense<0.000000e+00> : vector<16x32xf32>
    %95 = tpu.matmul %92, %94, %cst_54 {dimension_numbers = #tpu.dot_dimension_numbers<[1], [0], [0], [1], [0, 0, 1, 1], [], []>} : vector<16x32xbf16>, vector<32x32xbf16>, vector<16x32xf32> -> vector<16x32xf32>
    %c1_55 = arith.constant 1 : index
    %c0_56 = arith.constant 0 : index
    %c0_57 = arith.constant 0 : index
    %96 = vector.load %arg7[%c1_55, %c0_56, %c0_57] : memref<3x1x32xf32, #tpu.memory_space<vmem>>, vector<1x1x32xf32>
    %97 = vector.shape_cast %96 : vector<1x1x32xf32> to vector<1x32xf32>
    %98 = vector.broadcast %97 : vector<1x32xf32> to vector<16x32xf32>
    %99 = arith.addf %95, %98 : vector<16x32xf32>
    %100 = arith.addf %61, %99 : vector<16x32xf32>
    %c4_i32 = arith.constant 4 : i32
    %101 = vector.broadcast %c4_i32 : i32 to vector<16x32xi32>
    %102 = arith.cmpi sge, %22, %101 : vector<16x32xi32>
    %c4_i32_58 = arith.constant 4 : i32
    %103 = tpu.dynamic_rotate %100 by %c4_i32_58 dim 0 : vector<16x32xf32>, i32 -> vector<16x32xf32>
    %cst_59 = arith.constant 0.000000e+00 : f32
    %104 = vector.broadcast %cst_59 : f32 to vector<16x32xf32>
    %105 = arith.select %102, %103, %104 : vector<16x32xi1>, vector<16x32xf32>
    %c12_i32 = arith.constant 12 : i32
    %106 = vector.broadcast %c12_i32 : i32 to vector<16x32xi32>
    %107 = arith.cmpi slt, %22, %106 : vector<16x32xi32>
    %c12_i32_60 = arith.constant 12 : i32
    %108 = tpu.dynamic_rotate %100 by %c12_i32_60 dim 0 : vector<16x32xf32>, i32 -> vector<16x32xf32>
    %cst_61 = arith.constant 0.000000e+00 : f32
    %109 = vector.broadcast %cst_61 : f32 to vector<16x32xf32>
    %110 = arith.select %107, %108, %109 : vector<16x32xi1>, vector<16x32xf32>
    %111 = arith.truncf %100 : vector<16x32xf32> to vector<16x32xbf16>
    %112 = arith.truncf %105 : vector<16x32xf32> to vector<16x32xbf16>
    %c6 = arith.constant 6 : index
    %c0_62 = arith.constant 0 : index
    %c0_63 = arith.constant 0 : index
    %113 = vector.load %arg4[%c6, %c0_62, %c0_63] : memref<9x32x32xbf16, #tpu.memory_space<vmem>>, vector<1x32x32xbf16>
    %114 = vector.shape_cast %113 : vector<1x32x32xbf16> to vector<32x32xbf16>
    %cst_64 = arith.constant dense<0.000000e+00> : vector<16x32xf32>
    %115 = tpu.matmul %112, %114, %cst_64 {dimension_numbers = #tpu.dot_dimension_numbers<[1], [0], [0], [1], [0, 0, 1, 1], [], []>} : vector<16x32xbf16>, vector<32x32xbf16>, vector<16x32xf32> -> vector<16x32xf32>
    %c7 = arith.constant 7 : index
    %c0_65 = arith.constant 0 : index
    %c0_66 = arith.constant 0 : index
    %116 = vector.load %arg4[%c7, %c0_65, %c0_66] : memref<9x32x32xbf16, #tpu.memory_space<vmem>>, vector<1x32x32xbf16>
    %117 = vector.shape_cast %116 : vector<1x32x32xbf16> to vector<32x32xbf16>
    %cst_67 = arith.constant dense<0.000000e+00> : vector<16x32xf32>
    %118 = tpu.matmul %111, %117, %cst_67 {dimension_numbers = #tpu.dot_dimension_numbers<[1], [0], [0], [1], [0, 0, 1, 1], [], []>} : vector<16x32xbf16>, vector<32x32xbf16>, vector<16x32xf32> -> vector<16x32xf32>
    %119 = arith.addf %115, %118 : vector<16x32xf32>
    %120 = arith.truncf %110 : vector<16x32xf32> to vector<16x32xbf16>
    %c8 = arith.constant 8 : index
    %c0_68 = arith.constant 0 : index
    %c0_69 = arith.constant 0 : index
    %121 = vector.load %arg4[%c8, %c0_68, %c0_69] : memref<9x32x32xbf16, #tpu.memory_space<vmem>>, vector<1x32x32xbf16>
    %122 = vector.shape_cast %121 : vector<1x32x32xbf16> to vector<32x32xbf16>
    %cst_70 = arith.constant dense<0.000000e+00> : vector<16x32xf32>
    %123 = tpu.matmul %120, %122, %cst_70 {dimension_numbers = #tpu.dot_dimension_numbers<[1], [0], [0], [1], [0, 0, 1, 1], [], []>} : vector<16x32xbf16>, vector<32x32xbf16>, vector<16x32xf32> -> vector<16x32xf32>
    %124 = arith.addf %119, %123 : vector<16x32xf32>
    %c2_71 = arith.constant 2 : index
    %c0_72 = arith.constant 0 : index
    %c0_73 = arith.constant 0 : index
    %125 = vector.load %arg5[%c2_71, %c0_72, %c0_73] : memref<3x1x32xf32, #tpu.memory_space<vmem>>, vector<1x1x32xf32>
    %126 = vector.shape_cast %125 : vector<1x1x32xf32> to vector<1x32xf32>
    %127 = vector.broadcast %126 : vector<1x32xf32> to vector<16x32xf32>
    %128 = arith.addf %124, %127 : vector<16x32xf32>
    %cst_74 = arith.constant 0.000000e+00 : f32
    %129 = vector.broadcast %cst_74 : f32 to vector<16x32xf32>
    %130 = arith.maximumf %128, %129 : vector<16x32xf32>
    %131 = arith.truncf %130 : vector<16x32xf32> to vector<16x32xbf16>
    %c2_75 = arith.constant 2 : index
    %c0_76 = arith.constant 0 : index
    %c0_77 = arith.constant 0 : index
    %132 = vector.load %arg6[%c2_75, %c0_76, %c0_77] : memref<3x32x32xbf16, #tpu.memory_space<vmem>>, vector<1x32x32xbf16>
    %133 = vector.shape_cast %132 : vector<1x32x32xbf16> to vector<32x32xbf16>
    %cst_78 = arith.constant dense<0.000000e+00> : vector<16x32xf32>
    %134 = tpu.matmul %131, %133, %cst_78 {dimension_numbers = #tpu.dot_dimension_numbers<[1], [0], [0], [1], [0, 0, 1, 1], [], []>} : vector<16x32xbf16>, vector<32x32xbf16>, vector<16x32xf32> -> vector<16x32xf32>
    %c2_79 = arith.constant 2 : index
    %c0_80 = arith.constant 0 : index
    %c0_81 = arith.constant 0 : index
    %135 = vector.load %arg7[%c2_79, %c0_80, %c0_81] : memref<3x1x32xf32, #tpu.memory_space<vmem>>, vector<1x1x32xf32>
    %136 = vector.shape_cast %135 : vector<1x1x32xf32> to vector<1x32xf32>
    %137 = vector.broadcast %136 : vector<1x32xf32> to vector<16x32xf32>
    %138 = arith.addf %134, %137 : vector<16x32xf32>
    %139 = arith.addf %100, %138 : vector<16x32xf32>
    %140 = arith.truncf %139 : vector<16x32xf32> to vector<16x32xbf16>
    %c0_82 = arith.constant 0 : index
    %c0_83 = arith.constant 0 : index
    %141 = vector.load %arg8[%c0_82, %c0_83] : memref<32x128xbf16, #tpu.memory_space<vmem>>, vector<32x128xbf16>
    %cst_84 = arith.constant dense<0.000000e+00> : vector<16x128xf32>
    %142 = tpu.matmul %140, %141, %cst_84 {dimension_numbers = #tpu.dot_dimension_numbers<[1], [0], [0], [1], [0, 0, 1, 1], [], []>} : vector<16x32xbf16>, vector<32x128xbf16>, vector<16x128xf32> -> vector<16x128xf32>
    %c0_85 = arith.constant 0 : index
    %c0_86 = arith.constant 0 : index
    %143 = vector.load %arg9[%c0_85, %c0_86] : memref<1x128xf32, #tpu.memory_space<vmem>>, vector<1x128xf32>
    %144 = vector.broadcast %143 : vector<1x128xf32> to vector<16x128xf32>
    %145 = arith.addf %142, %144 : vector<16x128xf32>
    %146 = arith.truncf %145 : vector<16x128xf32> to vector<16x128xbf16>
    %c0_87 = arith.constant 0 : index
    %c0_88 = arith.constant 0 : index
    %147 = vector.load %arg10[%c0_87, %c0_88] : memref<16x128xbf16, #tpu.memory_space<vmem>>, vector<16x128xbf16>
    tpu.vector_store %arg10[%c0_87, %c0_88], %146 {strides = array<i32>} : memref<16x128xbf16, #tpu.memory_space<vmem>>, vector<16x128xbf16>,
    return
  }
  func.func @transform_0(%arg0: i32) -> (i32, i32) {
    %c0_i32 = arith.constant 0 : i32
    %c0_i32_0 = arith.constant 0 : i32
    return %arg0, %c0_i32 : i32, i32
  }
  func.func @transform_1(%arg0: i32) -> (i32, i32) {
    %c0_i32 = arith.constant 0 : i32
    %c0_i32_0 = arith.constant 0 : i32
    %c0_i32_1 = arith.constant 0 : i32
    return %c0_i32, %c0_i32_0 : i32, i32
  }
  func.func @transform_2(%arg0: i32) -> (i32, i32) {
    %c0_i32 = arith.constant 0 : i32
    %c0_i32_0 = arith.constant 0 : i32
    %c0_i32_1 = arith.constant 0 : i32
    return %c0_i32, %c0_i32_0 : i32, i32
  }
  func.func @transform_3(%arg0: i32) -> (i32, i32, i32) {
    %c0_i32 = arith.constant 0 : i32
    %c0_i32_0 = arith.constant 0 : i32
    %c0_i32_1 = arith.constant 0 : i32
    %c0_i32_2 = arith.constant 0 : i32
    return %c0_i32, %c0_i32_0, %c0_i32_1 : i32, i32, i32
  }
  func.func @transform_4(%arg0: i32) -> (i32, i32, i32) {
    %c0_i32 = arith.constant 0 : i32
    %c0_i32_0 = arith.constant 0 : i32
    %c0_i32_1 = arith.constant 0 : i32
    %c0_i32_2 = arith.constant 0 : i32
    return %c0_i32, %c0_i32_0, %c0_i32_1 : i32, i32, i32
  }
  func.func @transform_5(%arg0: i32) -> (i32, i32, i32) {
    %c0_i32 = arith.constant 0 : i32
    %c0_i32_0 = arith.constant 0 : i32
    %c0_i32_1 = arith.constant 0 : i32
    %c0_i32_2 = arith.constant 0 : i32
    return %c0_i32, %c0_i32_0, %c0_i32_1 : i32, i32, i32
  }
  func.func @transform_6(%arg0: i32) -> (i32, i32, i32) {
    %c0_i32 = arith.constant 0 : i32
    %c0_i32_0 = arith.constant 0 : i32
    %c0_i32_1 = arith.constant 0 : i32
    %c0_i32_2 = arith.constant 0 : i32
    return %c0_i32, %c0_i32_0, %c0_i32_1 : i32, i32, i32
  }
  func.func @transform_7(%arg0: i32) -> (i32, i32) {
    %c0_i32 = arith.constant 0 : i32
    %c0_i32_0 = arith.constant 0 : i32
    %c0_i32_1 = arith.constant 0 : i32
    return %c0_i32, %c0_i32_0 : i32, i32
  }
  func.func @transform_8(%arg0: i32) -> (i32, i32) {
    %c0_i32 = arith.constant 0 : i32
    %c0_i32_0 = arith.constant 0 : i32
    %c0_i32_1 = arith.constant 0 : i32
    return %c0_i32, %c0_i32_0 : i32, i32
  }
  func.func @transform_9(%arg0: i32) -> (i32, i32) {
    %c0_i32 = arith.constant 0 : i32
    %c0_i32_0 = arith.constant 0 : i32
    return %arg0, %c0_i32 : i32, i32
  }
}

</mosaic_0001>

<bundles_post_ra>
// kernel: tpu_custom_call.1
= control target key start
LH: loop header
LB: loop body
LE: loop exit
PB: predicated region body
PF: predicated region fallthrough
CT: control target
= control target key end

     0   :  { %14 = vsyncpa [#allocation3], 0  ;;  %s2302_s0 = inlined_call_operand.vmem [shape: bf16[32,4], index: 0, kind: input, shape index: {}]   ;;  %s2303_s1 = inlined_call_operand.vmem [shape: bf16[4,32], index: 1, kind: input, shape index: {}]   ;;  %s2304_s2 = inlined_call_operand.vmem [shape: f32[1,32], index: 2, kind: input, shape index: {}]   ;;  %s2305_s3 = inlined_call_operand.hbm [shape: bf16[9,32,32], index: 3, kind: input, shape index: {}]   ;;  %s2306_s4 = inlined_call_operand.vmem [shape: f32[3,1,32], index: 4, kind: input, shape index: {}]   ;;  %s2307_s5 = inlined_call_operand.hbm [shape: bf16[3,32,32], index: 5, kind: input, shape index: {}]   ;;  %s2308_s6 = inlined_call_operand.vmem [shape: f32[3,1,32], index: 6, kind: input, shape index: {}]   ;;  %s2309_s7 = inlined_call_operand.vmem [shape: bf16[32,128], index: 7, kind: input, shape index: {}]   ;;  %s2310_s8 = inlined_call_operand.vmem [shape: f32[1,128], index: 8, kind: input, shape index: {}]   ;;  %s2311_s9 = inlined_call_operand.hbm [shape: bf16[32,128], index: 9, kind: output, shape index: {}]  }
   0x1   :  { %15 = vsyncpa [#allocation6], 0 }
   0x2   :  { %16 = vsyncpa [#allocation4], 0 }
   0x3   :  { %18 = vsyncpa [#allocation4 + $0x1], 0  ;;  %s1998_s30 = smov 0   ;;  %s2000_s10 = smov 0  }
   0x4   :  { %s2002_s11 = smov 0   ;;  %s2004_s12 = smov 0  }
   0x5 LB: > { %s2019_s13 = sadd.s32 4294967295, %s1937_s12   ;;  %s1494_s14 = sadd.s32 4294967294, %s1937_s12   ;;  %s1937_s12 = sphi %s2004_s12, %s2325_s12   ;;  %s1933_s11 = sphi %s2002_s11, %s2324_s11   ;;  %s1929_s10 = sphi %s2000_s10, %s2323_s10   ;;  %s1925_s30 = sphi %s1998_s30, %s2322_s30  }
   0x6   : > { %s2023_s15 = sadd.s32 1, %s1937_s12   ;;  %s225_s16 = sadd.s32 1, %s1933_s11 }
   0x7   : > { %s222_s17 = ssub.s32 %s1937_s12, %s2023_s15  ;;  %p235_p0 = scmp.ne.s32.totalorder %s1933_s11, %s1929_s10 }
   0x8   : > { %p223_p1 = scmp.eq.s32.totalorder %s222_s17, 0  ;;  %p236_p2 = scmp.eq.s32.totalorder %s2019_s13, 1 }
   0x9   : > { %p241_p3 = scmp.ne.s32.totalorder %s1929_s10, %s1925_s30  ;;  %p242_p4 = scmp.eq.s32.totalorder %s1494_s14, 1 }
   0xa   : > { %s2034_s18 = scalar_select %p223_p1, %s1933_s11, %s225_s16  }
   0xb   : > { %p2036_p5 = por %p236_p2, %p235_p0  ;;  %p2040_p6 = por %p242_p4, %p241_p3 }
   0xc   : > { %p1495_p7 = scmp.ge.s32.totalorder %s1937_s12, 1  ;;  %p249_p8 = scmp.lt.s32.totalorder %s1937_s12, 3 }
   0xd   : > { %s2314_s20 = scalar_select %p2040_p6, 1, 0 }
   0xe   : > { %p2312_p9 = scmp.eq.s32.totalorder %s2019_s13, 0  ;;  %p2047_p10 = pnand %p1495_p7, %p249_p8 }
   0xf   : > { %s1939_s22 = smov [#allocation2]   ;;  %s1940_s25 = smov [#allocation5]  }
  0x10   : > { %s267_s23 = sshll.u32 %s1939_s22, 4  ;;  %p1734_p11 = pneg %p2047_p10  ;;  %s268_s23 = int_to_ptr.vmem [resolvable:$true] %s267_s23 }
  0x11   : > { %s283_s26 = sshll.u32 %s1940_s25, 4  ;;  %s1828_s27 = scalar_lea.vmem %s268_s23, 2304  ;;  %s284_s26 = int_to_ptr.vmem [resolvable:$true] %s283_s26 }
  0x12   : > { %p2055_p12 = pnand %p2312_p9, %p1734_p11  ;;  %p1829_p0 = scmp.ne.s32.totalorder %s268_s23, %s1828_s27 }
  0x13   : > { %p1836_p3 = scmp.lt.s32.totalorder %s268_s23, %s268_s23  ;;  %p1837_p4 = scmp.lt.s32.totalorder %s1828_s27, %s1828_s27 }
  0x14   : > { %p1819_p13 = pneg %p2055_p12 }
  0x15   : > { %p1838_p7 = por %p1837_p4, %p1836_p3 }
  0x16   : > { %p1831_p1 = pnand %p1829_p0, %p1819_p13 }
  0x18   : > { %p1832_p2 = pneg %p1831_p1 }
  0x1a   : > { %p1839_p8 = pnand %p1838_p7, %p1832_p2 }
  0x1c   : > { %1842 = shalt.err (!%p1839_p8)
}
  0x1d   : > { %s1941_s28 = smov 64   ;;  %s1942_s29 = smov 4  }
  0x1e   : > { %1737 = dma.hbm_to_vmem [thread:$0]  (!%p2055_p12), %s2305_s3, 2304, %s268_s23, [#allocation3], %s1941_s28, %s1941_s28, %s1942_s29  }
  0x1f   : > { %s1854_s17 = scalar_lea.vmem %s284_s26, 768  ;;  %p1862_p9 = scmp.lt.s32.totalorder %s284_s26, %s284_s26 }
  0x20   : > { %p1855_p11 = scmp.ne.s32.totalorder %s284_s26, %s1854_s17  ;;  %p1863_p6 = scmp.lt.s32.totalorder %s1854_s17, %s1854_s17 }
  0x22   : > { %p1857_p0 = pnand %p1855_p11, %p1819_p13  ;;  %p1864_p3 = por %p1863_p6, %p1862_p9 }
  0x24   : > { %p1858_p1 = pneg %p1857_p0 }
  0x26   : > { %p1865_p2 = pnand %p1864_p3, %p1858_p1 }
  0x28   : > { %1868 = shalt.err (!%p1865_p2)
}
  0x29   : > { %1740 = dma.hbm_to_vmem [thread:$0]  (!%p2055_p12), %s2307_s5, 768, %s284_s26, [#allocation6], %s1941_s28, %s1941_s28, %s1942_s29  }
  0x2a   : > { %317 = sbr.rel (%p2047_p10) target bundleno = 1722 (0x6ba), region = 56  ;;  %p2317_p4 = scmp.eq.s32.totalorder (!%p2047_p10), %s2019_s13, 0 }
  0x2f   : > { %1912 = dma.done.wait (%p2317_p4), [#allocation3], 2304   ;;  %p2318_p13 = pmov %p2317_p4 }
  0x30   : > { %p2319_p7 = pmov %p2317_p4 }
  0x31   : > { %1914 = vsyncadd (%p2318_p13), [#allocation3], 4294964992 }
  0x32   : > { %1916 = dma.done.wait (%p2319_p7), [#allocation6], 768   ;;  %p2320_p6 = pmov %p2317_p4 }
  0x33   : > { %s1503_s23 = sshll.u32 %s2019_s13, 1  ;;  %v1943_v0 = vmov 0.0   ;;  %vm1944_vm0 = vmmov 0   ;;  %vm384_vm1 = vcmask 1041408   ;;  %v367_v1 = vld [vmem:[%s2303_s1] sm:$0x3]  ;;  %v429_v8 = vlaneseq }
  0x34   : > { %1918 = vsyncadd (%p2320_p6), [#allocation6], 4294966528  ;;  %1614 = vmatprep.subr.bf16.mxu0 %v1943_v0  ;;  %1616 = vmatprep.mubr.msk.bf16.mxu0 %vm1944_vm0, %v1943_v0  ;;  %p358_p9 = scmp.lt.s32.totalorder %s1503_s23, 3  ;;  %v386_v2 = vsel %vm384_vm1, %v367_v1, 0  ;;  %vm380_vm2 = vcmask 31744   ;;  %v1791_v4 = vld [vmem:[#allocation2 + $0x18] sm:$0xff]  }
  0x35   : > { %1620 = vmatprep.subr.bf16.mxu1 %v1943_v0  ;;  %1624 = vmatprep.mubr.msk.bf16.mxu1 %vm1944_vm0, %v1943_v0  ;;  %v1792_v5 = vld [vmem:[#allocation2 + $0x10] sm:$0xff]   ;;  %v1793_v6 = vld [vmem:[#allocation2 + $0x8] sm:$0xff]   ;;  %v1795_v7 = vld [vmem:[#allocation2] sm:$0xff]   ;;  %v2107_v9 = vshrl.u32 %v429_v8, 7  ;;  %vm497_vm5 = vcmask 261120   ;;  %s1567_s14 = sshll.u32 %s2019_s13, 7 }
  0x36   : > { %s2327_s23 = smov (!%p358_p9, %s1503_s23), 3  ;;  %1615 = vmatpush3.bf16.msra.mxu0 %v386_v2  ;;  %1621 = vmatpush3.bf16.msra.mxu1 %v1791_v4  ;;  %v1505_v10 = vld [vmem:[%s2304_s2] ss:$0 sm:$0xff]  ;;  %v1794_v21 = vld [vmem:[#allocation2 + $0x28] sm:$0xff]   ;;  %v1796_v30 = vld [vmem:[#allocation2 + $0x20] sm:$0xff]   ;;  %s2260_s22 = scalar_lea.hbm %s2311_s9, %s1567_s14 }
  0x37   : > { %s1504_s21 = sshll.u32 %s2327_s23, 2  ;;  %1628 = vmatprep.subr.bf16.mxu0 %v1943_v0  ;;  %1622 = vmatprep.subr.bf16.mxu1 %v1943_v0  ;;  %v431_v12 = vadd.s32 8, %v2107_v9  ;;  %v2116_v15 = vand.u32 15, %v2107_v9  ;;  %vm460_vm3 = vcmp.lt.s32.totalorder %v2107_v9, 1  ;;  %vm469_vm4 = vcmp.lt.s32.totalorder %v2107_v9, 7  ;;  %v1797_v35 = vld [vmem:[#allocation5 + $0x8] sm:$0xff]  }
  0x38   : > { %s361_s27 = scalar_lea.vmem %s2302_s0, %s1504_s21  ;;  %v1798_v36 = vld [vmem:[#allocation5] sm:$0xff]   ;;  %v1799_v59 = vld [vmem:[#allocation2 + $0x48] sm:$0xff]   ;;  %v1800_v60 = vld [vmem:[#allocation2 + $0x40] sm:$0xff]   ;;  %vm747_vm9 = vcmp.lt.s32.totalorder %v2107_v9, 2  ;;  %vm756_vm10 = vcmp.lt.s32.totalorder %v2107_v9, 6  ;;  %vm1037_vm12 = vcmp.lt.s32.totalorder %v2107_v9, 4 }
  0x39   : > { %v1790_v3 = vld [vmem:[%s361_s27] sm:$0xff]   ;;  %v2121_v18 = vand.u32 15, %v431_v12  ;;  %vm456_vm6 = vcmp.ge.s32.totalorder %v2116_v15, 1  ;;  %v1801_v61 = vld [vmem:[#allocation2 + $0x38] sm:$0xff]   ;;  %vm743_vm8 = vcmp.ge.s32.totalorder %v2116_v15, 2  ;;  %vm1033_vm13 = vcmp.ge.s32.totalorder %v2116_v15, 4 }
  0x3a   : > { %1617 = vmatmul.mubr.msk.bf16.vlgmr.msra.gmra.mxu0 %vm380_vm2, %v1790_v3  ;;  %1623 = vmatpush3.bf16.msra.mxu1 %v1792_v5  ;;  %v1517_v47 = vld [vmem:[%s2306_s4] ss:$0 sm:$0xff]  ;;  %s354_s21 = sand.u32 1, %s1929_s10   ;;  %s1945_s13 = smov [#allocation7]  }
  0x3b   : > { %1632 = vmatprep.mubr.msk.bf16.mxu0 %vm1944_vm0, %v1943_v0  ;;  %1629 = vmatpush3.bf16.msra.mxu0 %v1793_v6  ;;  %vm466_vm7 = vcmp.lt.s32.totalorder %v2121_v18, 15  ;;  %v1803_v62 = vld [vmem:[#allocation2 + $0x30] sm:$0xff]   ;;  %vm753_vm11 = vcmp.lt.s32.totalorder %v2121_v18, 14  ;;  %vm1043_vm14 = vcmp.lt.s32.totalorder %v2121_v18, 12  ;;  %v1813_v18 = vld [vmem:[#allocation5 + $0x28] sm:$0xff]   ;;  %s1502_s24 = sshll.u32 %s354_s21, 3 }
  0x3c   : > { %1636 = vmatprep.subr.bf16.mxu1 %v1943_v0  ;;  %1630 = vmatprep.subr.bf16.mxu0 %v1943_v0  ;;  %v1518_v63 = vld [vmem:[%s2308_s6] ss:$0 sm:$0xff]  ;;  %s356_s28 = scalar_lea.vmem [#allocation7], %s1502_s24  ;;  %s2262_s25 = scalar_lea.sflag [#allocation4], %s354_s21 }
  0x3d   : > { %s1410_s29 = sshll.u32 %s356_s28, 4  ;;  %s1873_s24 = sshll.u32 %s1945_s13, 4  ;;  %s2255_s29 = int_to_ptr.vmem [resolvable:$true] %s1410_s29  ;;  %s1874_s24 = int_to_ptr.vmem [resolvable:$false] %s1873_s24 }
  0x3e   : > { %s1869_s23 = scalar_lea.vmem %s2255_s29, 128  ;;  %s1875_s26 = scalar_lea.vmem %s1874_s24, 256 }
  0x3f   : > { %1631 = vmatpush3.bf16.msra.mxu0 %v1795_v7  ;;  %p1870_p10 = scmp.ne.s32.totalorder %s2255_s29, %s1869_s23  ;;  %p1876_p11 = scmp.lt.s32.totalorder %s2255_s29, %s1874_s24 }
  0x40   : > { %1644 = vmatprep.subr.bf16.mxu0 %v1943_v0  ;;  %p1877_p0 = scmp.lt.s32.totalorder %s1875_s26, %s1869_s23 }
  0x41   : > { %p1871_p12 = pnand %p1870_p10, %p2036_p5 }
  0x42   : > { %p1878_p1 = por %p1877_p0, %p1876_p11 }
  0x43   : > { %p1872_p8 = pneg %p1871_p12 }
  0x45   : > { %p1879_p3 = pnand %p1878_p1, %p1872_p8 }
  0xfa   : > { %v422_v11 = vpop.f32.mrf.mxu0 }
  0xfb   : > { %v2113_v13 = vadd.f32 %v1505_v10, %v422_v11  ;;  %v1802_v11 = vld [vmem:[#allocation2 + $0x58] sm:$0xff]  }
  0xfc   : > { %v1618_v14 = vpop.f32.mrf.mxu0 }
  0xfd   : > { %v458_v19 = vrot.slane %v2113_v13, 7  ;;  %v467_v22 = vrot.slane %v2113_v13, 1 }
  0xfe   : > { %v425_v16 = vpop.f32.mrf.mxu0 }
  0xff   : > { %v2118_v17 = vadd.f32 %v1505_v10, %v425_v16 }
 0x100   : > { %v1619_v20 = vpop.f32.mrf.mxu0 }
 0x101   : > { %v459_v23 = vrot.slane %v2118_v17, 7  ;;  %v468_v24 = vrot.slane %v2118_v17, 1  ;;  %v474_v25 = vpack.c.bf16 %v2118_v17, %v2113_v13 }
 0x103   : > { %v462_v26 = vsel %vm460_vm3, %v459_v23, %v458_v19  ;;  %v471_v27 = vsel %vm469_vm4, %v468_v24, %v467_v22  ;;  %1625 = vmatmul.mubr.msk.bf16.vlgmr.msra.gmra.mxu1 %vm497_vm5, %v474_v25  ;;  %v461_v28 = vsel %vm460_vm3, %v458_v19, %v459_v23  ;;  %v470_v32 = vsel %vm469_vm4, %v467_v22, %v468_v24  ;;  %v1804_v22 = vld [vmem:[#allocation2 + $0x50] sm:$0xff]  }
 0x104   : > { %1637 = vmatpush3.bf16.msra.mxu1 %v1794_v21  ;;  %v463_v29 = vsel %vm456_vm6, %v462_v26, 0.0  ;;  %1640 = vmatprep.mubr.msk.bf16.mxu1 %vm1944_vm0, %v1943_v0  ;;  %v473_v33 = vsel %vm466_vm7, %v471_v27, 0.0  ;;  %v1805_v27 = vld [vmem:[#allocation5 + $0x18] sm:$0xff]  }
 0x105   : > { %1638 = vmatprep.subr.bf16.mxu1 %v1943_v0  ;;  %v475_v31 = vpack.c.bf16 %v461_v28, %v463_v29  ;;  %v598_v34 = vpack.c.bf16 %v473_v33, %v470_v32  ;;  %v1806_v28 = vld [vmem:[#allocation5 + $0x10] sm:$0xff]  }
 0x107   : > { %1633 = vmatmul.mubr.msk.bf16.vlgmr.msra.gmra.mxu0 %vm497_vm5, %v475_v31 }
 0x108   : > { %1639 = vmatpush3.bf16.msra.mxu1 %v1796_v30  ;;  %1648 = vmatprep.mubr.msk.bf16.mxu0 %vm1944_vm0, %v1943_v0 }
 0x109   : > { %1652 = vmatprep.subr.bf16.mxu1 %v1943_v0  ;;  %1645 = vmatpush3.bf16.msra.mxu0 %v1797_v35 }
 0x10a   : > { %1646 = vmatprep.subr.bf16.mxu0 %v1943_v0 }
 0x10b   : > { %1641 = vmatmul.mubr.msk.bf16.vlgmr.msra.gmra.mxu1 %vm497_vm5, %v598_v34 }
 0x10c   : > { %1656 = vmatprep.mubr.msk.bf16.mxu1 %vm1944_vm0, %v1943_v0  ;;  %1653 = vmatpush3.bf16.msra.mxu1 %v1799_v59 }
 0x10d   : > { %1647 = vmatpush3.bf16.msra.mxu0 %v1798_v36  ;;  %1654 = vmatprep.subr.bf16.mxu1 %v1943_v0 }
 0x10e   : > { %1660 = vmatprep.subr.bf16.mxu0 %v1943_v0 }
 0x110   : > { %1655 = vmatpush3.bf16.msra.mxu1 %v1800_v60 }
 0x111   : > { %1668 = vmatprep.subr.bf16.mxu1 %v1943_v0 }
 0x1c3   : > { %v535_v37 = vpop.f32.mrf.mxu1 }
 0x1c5   : > { %v1626_v38 = vpop.f32.mrf.mxu1 }
 0x1c7   : > { %v538_v39 = vpop.f32.mrf.mxu1  ;;  %v591_v40 = vpop.f32.mrf.mxu0 }
 0x1c8   : > { %v592_v43 = vadd.f32 %v591_v40, %v535_v37 }
 0x1c9   : > { %v1627_v41 = vpop.f32.mrf.mxu1  ;;  %v1634_v42 = vpop.f32.mrf.mxu0 }
 0x1cb   : > { %v594_v44 = vpop.f32.mrf.mxu0  ;;  %v653_v45 = vpop.f32.mrf.mxu1 }
 0x1cc   : > { %v660_v46 = vadd.f32 %v653_v45, %v592_v43  ;;  %v595_v50 = vadd.f32 %v594_v44, %v538_v39  ;;  %v1532_v39 = vld [vmem:[%s2306_s4 + $0x1] ss:$0 sm:$0xff] }
 0x1cd   : > { %v1635_v48 = vpop.f32.mrf.mxu0  ;;  %v1642_v49 = vpop.f32.mrf.mxu1 }
 0x1ce   : > { %v669_v52 = vadd.f32 %v1517_v47, %v660_v46 }
 0x1cf   : > { %v656_v51 = vpop.f32.mrf.mxu1 }
 0x1d0   : > { %v661_v53 = vadd.f32 %v656_v51, %v595_v50  ;;  %v671_v56 = vmax.f32 %v669_v52, 0.0  ;;  %v1807_v51 = vld [vmem:[#allocation2 + $0x78] sm:$0xff]   ;;  %v1808_v52 = vld [vmem:[#allocation2 + $0x70] sm:$0xff]  }
 0x1d1   : > { %v1643_v54 = vpop.f32.mrf.mxu1 }
 0x1d2   : > { %v670_v55 = vadd.f32 %v1517_v47, %v661_v53  ;;  %v1809_v53 = vld [vmem:[#allocation2 + $0x68] sm:$0xff]   ;;  %v1811_v54 = vld [vmem:[#allocation2 + $0x60] sm:$0xff]  }
 0x1d4   : > { %v672_v57 = vmax.f32 %v670_v55, 0.0  ;;  %v1534_v55 = vld [vmem:[%s2308_s6 + $0x1] ss:$0 sm:$0xff] }
 0x1d6   : > { %v673_v58 = vpack.c.bf16 %v672_v57, %v671_v56 }
 0x1d8   : > { %1649 = vmatmul.mubr.msk.bf16.vlgmr.msra.gmra.mxu0 %vm497_vm5, %v673_v58 }
 0x1d9   : > { %1664 = vmatprep.mubr.msk.bf16.mxu0 %vm1944_vm0, %v1943_v0  ;;  %1661 = vmatpush3.bf16.msra.mxu0 %v1801_v61 }
 0x1da   : > { %1662 = vmatprep.subr.bf16.mxu0 %v1943_v0 }
 0x1dd   : > { %1663 = vmatpush3.bf16.msra.mxu0 %v1803_v62 }
 0x1de   : > { %1676 = vmatprep.subr.bf16.mxu0 %v1943_v0 }
 0x298   : > { %v734_v1 = vpop.f32.mrf.mxu0 }
 0x299   : > { %v735_v2 = vadd.f32 %v1518_v63, %v734_v1  ;;  %v1810_v1 = vld [vmem:[#allocation2 + $0x88] sm:$0xff]  }
 0x29a   : > { %v1650_v3 = vpop.f32.mrf.mxu0 }
 0x29b   : > { %v2163_v4 = vadd.f32 %v735_v2, %v2113_v13 }
 0x29c   : > { %v737_v5 = vpop.f32.mrf.mxu0 }
 0x29d   : > { %v738_v6 = vadd.f32 %v1518_v63, %v737_v5  ;;  %v745_v10 = vrot.slane %v2163_v4, 6  ;;  %v754_v12 = vrot.slane %v2163_v4, 2 }
 0x29e   : > { %v1651_v7 = vpop.f32.mrf.mxu0 }
 0x29f   : > { %v2166_v8 = vadd.f32 %v738_v6, %v2118_v17 }
 0x2a1   : > { %v746_v13 = vrot.slane %v2166_v8, 6  ;;  %v755_v14 = vrot.slane %v2166_v8, 2  ;;  %v761_v16 = vpack.c.bf16 %v2166_v8, %v2163_v4 }
 0x2a3   : > { %1657 = vmatmul.mubr.msk.bf16.vlgmr.msra.gmra.mxu1 %vm497_vm5, %v761_v16  ;;  %v748_v17 = vsel %vm747_vm9, %v745_v10, %v746_v13  ;;  %v749_v19 = vsel %vm747_vm9, %v746_v13, %v745_v10  ;;  %v758_v20 = vsel %vm756_vm10, %v755_v14, %v754_v12  ;;  %v757_v24 = vsel %vm756_vm10, %v754_v12, %v755_v14 }
 0x2a4   : > { %1669 = vmatpush3.bf16.msra.mxu1 %v1802_v11  ;;  %v750_v21 = vsel %vm743_vm8, %v749_v19, 0.0  ;;  %1672 = vmatprep.mubr.msk.bf16.mxu1 %vm1944_vm0, %v1943_v0  ;;  %v760_v25 = vsel %vm753_vm11, %v758_v20, 0.0  ;;  %v1814_v11 = vld [vmem:[#allocation5 + $0x20] sm:$0xff]  }
 0x2a5   : > { %1670 = vmatprep.subr.bf16.mxu1 %v1943_v0  ;;  %v762_v23 = vpack.c.bf16 %v748_v17, %v750_v21  ;;  %v885_v26 = vpack.c.bf16 %v760_v25, %v757_v24  ;;  %v1548_v24 = vld [vmem:[%s2306_s4 + $0x2] ss:$0 sm:$0xff] }
 0x2a7   : > { %1665 = vmatmul.mubr.msk.bf16.vlgmr.msra.gmra.mxu0 %vm497_vm5, %v762_v23 }
 0x2a8   : > { %1671 = vmatpush3.bf16.msra.mxu1 %v1804_v22  ;;  %1680 = vmatprep.mubr.msk.bf16.mxu0 %vm1944_vm0, %v1943_v0 }
 0x2a9   : > { %1684 = vmatprep.subr.bf16.mxu1 %v1943_v0  ;;  %1677 = vmatpush3.bf16.msra.mxu0 %v1805_v27 }
 0x2aa   : > { %1678 = vmatprep.subr.bf16.mxu0 %v1943_v0 }
 0x2ab   : > { %1673 = vmatmul.mubr.msk.bf16.vlgmr.msra.gmra.mxu1 %vm497_vm5, %v885_v26 }
 0x2ac   : > { %1688 = vmatprep.mubr.msk.bf16.mxu1 %vm1944_vm0, %v1943_v0  ;;  %1685 = vmatpush3.bf16.msra.mxu1 %v1807_v51 }
 0x2ad   : > { %1679 = vmatpush3.bf16.msra.mxu0 %v1806_v28  ;;  %1686 = vmatprep.subr.bf16.mxu1 %v1943_v0 }
 0x2ae   : > { %1692 = vmatprep.subr.bf16.mxu0 %v1943_v0 }
 0x2b0   : > { %1687 = vmatpush3.bf16.msra.mxu1 %v1808_v52 }
 0x2b1   : > { %1700 = vmatprep.subr.bf16.mxu1 %v1943_v0 }
 0x363   : > { %v822_v29 = vpop.f32.mrf.mxu1 }
 0x365   : > { %v1658_v30 = vpop.f32.mrf.mxu1 }
 0x367   : > { %v825_v31 = vpop.f32.mrf.mxu1  ;;  %v878_v32 = vpop.f32.mrf.mxu0 }
 0x368   : > { %v879_v35 = vadd.f32 %v878_v32, %v822_v29 }
 0x369   : > { %v1659_v33 = vpop.f32.mrf.mxu1  ;;  %v1666_v34 = vpop.f32.mrf.mxu0 }
 0x36b   : > { %v881_v36 = vpop.f32.mrf.mxu0  ;;  %v940_v37 = vpop.f32.mrf.mxu1 }
 0x36c   : > { %v947_v38 = vadd.f32 %v940_v37, %v879_v35  ;;  %v882_v42 = vadd.f32 %v881_v36, %v825_v31  ;;  %v1815_v36 = vld [vmem:[%s2309_s7 + $0x8] sm:$0xff]   ;;  %v1816_v37 = vld [vmem:[%s2309_s7] sm:$0xff]  }
 0x36d   : > { %v1667_v40 = vpop.f32.mrf.mxu0  ;;  %v1674_v41 = vpop.f32.mrf.mxu1 }
 0x36e   : > { %v957_v44 = vadd.f32 %v1532_v39, %v947_v38  ;;  %v1550_v38 = vld [vmem:[%s2308_s6 + $0x2] ss:$0 sm:$0xff] }
 0x36f   : > { %v943_v43 = vpop.f32.mrf.mxu1 }
 0x370   : > { %v948_v45 = vadd.f32 %v943_v43, %v882_v42  ;;  %v959_v48 = vmax.f32 %v957_v44, 0.0 }
 0x371   : > { %v1675_v46 = vpop.f32.mrf.mxu1 }
 0x372   : > { %v958_v47 = vadd.f32 %v1532_v39, %v948_v45 }
 0x374   : > { %v960_v49 = vmax.f32 %v958_v47, 0.0 }
 0x376   : > { %v961_v50 = vpack.c.bf16 %v960_v49, %v959_v48  ;;  %v1554_v48 = vld [vmem:[%s2310_s8] ss:$0 sm:$0xff] }
 0x378   : > { %1681 = vmatmul.mubr.msk.bf16.vlgmr.msra.gmra.mxu0 %vm497_vm5, %v961_v50 }
 0x379   : > { %1696 = vmatprep.mubr.msk.bf16.mxu0 %vm1944_vm0, %v1943_v0  ;;  %1693 = vmatpush3.bf16.msra.mxu0 %v1809_v53 }
 0x37a   : > { %1694 = vmatprep.subr.bf16.mxu0 %v1943_v0 }
 0x37d   : > { %1695 = vmatpush3.bf16.msra.mxu0 %v1811_v54 }
 0x37e   : > { %1708 = vmatprep.subr.bf16.mxu0 %v1943_v0 }
 0x438   : > { %v1024_v56 = vpop.f32.mrf.mxu0 }
 0x439   : > { %v1025_v57 = vadd.f32 %v1534_v55, %v1024_v56 }
 0x43a   : > { %v1682_v58 = vpop.f32.mrf.mxu0 }
 0x43b   : > { %v2209_v60 = vadd.f32 %v1025_v57, %v2163_v4 }
 0x43c   : > { %v1027_v59 = vpop.f32.mrf.mxu0 }
 0x43d   : > { %v1028_v61 = vadd.f32 %v1534_v55, %v1027_v59  ;;  %v1035_v2 = vrot.slane %v2209_v60, 4 }
 0x43e   : > { %v1683_v62 = vpop.f32.mrf.mxu0 }
 0x43f   : > { %v2212_v63 = vadd.f32 %v1028_v61, %v2166_v8  ;;  %v1812_v8 = vld [vmem:[#allocation2 + $0x80] sm:$0xff]  }
 0x441   : > { %v1036_v3 = vrot.slane %v2212_v63, 4  ;;  %v1046_v5 = vpack.c.bf16 %v2212_v63, %v2209_v60 }
 0x443   : > { %v1038_v6 = vsel %vm1037_vm12, %v1035_v2, %v1036_v3  ;;  %v1039_v4 = vsel %vm1037_vm12, %v1036_v3, %v1035_v2  ;;  %1689 = vmatmul.mubr.msk.bf16.vlgmr.msra.gmra.mxu1 %vm497_vm5, %v1046_v5 }
 0x444   : > { %v1040_v7 = vsel %vm1033_vm13, %v1039_v4, 0.0  ;;  %1701 = vmatpush3.bf16.msra.mxu1 %v1810_v1  ;;  %1704 = vmatprep.mubr.msk.bf16.mxu1 %vm1944_vm0, %v1943_v0  ;;  %v1045_v15 = vsel %vm1043_vm14, %v1039_v4, 0.0 }
 0x445   : > { %1702 = vmatprep.subr.bf16.mxu1 %v1943_v0  ;;  %v1047_v9 = vpack.c.bf16 %v1038_v6, %v1040_v7  ;;  %v1170_v10 = vpack.c.bf16 %v1045_v15, %v1038_v6 }
 0x447   : > { %1697 = vmatmul.mubr.msk.bf16.vlgmr.msra.gmra.mxu0 %vm497_vm5, %v1047_v9 }
 0x448   : > { %1703 = vmatpush3.bf16.msra.mxu1 %v1812_v8  ;;  %1712 = vmatprep.mubr.msk.bf16.mxu0 %vm1944_vm0, %v1943_v0 }
 0x449   : > { %1716 = vmatprep.subr.bf16.mxu1 %v1943_v0  ;;  %1709 = vmatpush3.bf16.msra.mxu0 %v1813_v18 }
 0x44a   : > { %1710 = vmatprep.subr.bf16.mxu0 %v1943_v0 }
 0x44b   : > { %1705 = vmatmul.mubr.msk.bf16.vlgmr.msra.gmra.mxu1 %vm497_vm5, %v1170_v10 }
 0x44c   : > { %1720 = vmatprep.mubr.msk.bf16.mxu1 %vm1944_vm0, %v1943_v0  ;;  %1717 = vmatpush3.bf16.msra.mxu1 %v1815_v36 }
 0x44d   : > { %1711 = vmatpush3.bf16.msra.mxu0 %v1814_v11  ;;  %1718 = vmatprep.subr.bf16.mxu1 %v1943_v0 }
 0x450   : > { %1719 = vmatpush3.bf16.msra.mxu1 %v1816_v37 }
 0x503   : > { %v1107_v12 = vpop.f32.mrf.mxu1 }
 0x505   : > { %v1690_v13 = vpop.f32.mrf.mxu1 }
 0x507   : > { %v1110_v14 = vpop.f32.mrf.mxu1  ;;  %v1163_v16 = vpop.f32.mrf.mxu0 }
 0x508   : > { %v1164_v20 = vadd.f32 %v1163_v16, %v1107_v12 }
 0x509   : > { %v1691_v17 = vpop.f32.mrf.mxu1  ;;  %v1698_v19 = vpop.f32.mrf.mxu0 }
 0x50b   : > { %v1166_v21 = vpop.f32.mrf.mxu0  ;;  %v1225_v22 = vpop.f32.mrf.mxu1 }
 0x50c   : > { %v1232_v23 = vadd.f32 %v1225_v22, %v1164_v20  ;;  %v1167_v27 = vadd.f32 %v1166_v21, %v1110_v14 }
 0x50d   : > { %v1699_v25 = vpop.f32.mrf.mxu0  ;;  %v1706_v26 = vpop.f32.mrf.mxu1 }
 0x50e   : > { %v1242_v29 = vadd.f32 %v1548_v24, %v1232_v23 }
 0x50f   : > { %v1228_v28 = vpop.f32.mrf.mxu1 }
 0x510   : > { %v1233_v30 = vadd.f32 %v1228_v28, %v1167_v27  ;;  %v1244_v33 = vmax.f32 %v1242_v29, 0.0 }
 0x511   : > { %v1707_v31 = vpop.f32.mrf.mxu1 }
 0x512   : > { %v1243_v32 = vadd.f32 %v1548_v24, %v1233_v30 }
 0x514   : > { %v1245_v34 = vmax.f32 %v1243_v32, 0.0 }
 0x516   : > { %v1246_v35 = vpack.c.bf16 %v1245_v34, %v1244_v33 }
 0x518   : > { %1713 = vmatmul.mubr.msk.bf16.vlgmr.msra.gmra.mxu0 %vm497_vm5, %v1246_v35 }
 0x5d8   : > { %v1309_v39 = vpop.f32.mrf.mxu0 }
 0x5d9   : > { %v1310_v41 = vadd.f32 %v1550_v38, %v1309_v39 }
 0x5da   : > { %v1714_v40 = vpop.f32.mrf.mxu0 }
 0x5db   : > { %v1316_v45 = vadd.f32 %v1310_v41, %v2209_v60 }
 0x5dc   : > { %v1312_v42 = vpop.f32.mrf.mxu0 }
 0x5dd   : > { %v1313_v43 = vadd.f32 %v1550_v38, %v1312_v42 }
 0x5de   : > { %v1715_v44 = vpop.f32.mrf.mxu0 }
 0x5df   : > { %v1317_v0 = vadd.f32 %v1313_v43, %v2212_v63 }
 0x5e1   : > { %v1318_v46 = vpack.c.bf16 %v1317_v0, %v1316_v45 }
 0x5e3   : > { %1721 = vmatmul.mubr.msk.bf16.vlgmr.msra.gmra.mxu1 %vm497_vm5, %v1318_v46 }
 0x6a3   : > { %v1379_v47 = vpop.f32.mrf.mxu1 }
 0x6a4   : > { %v1380_v51 = vadd.f32 %v1554_v48, %v1379_v47 }
 0x6a5   : > { %v1722_v49 = vpop.f32.mrf.mxu1 }
 0x6a7   : > { %v1382_v50 = vpop.f32.mrf.mxu1 }
 0x6a8   : > { %v1383_v52 = vadd.f32 %v1554_v48, %v1382_v50 }
 0x6a9   : > { %v1723_v53 = vpop.f32.mrf.mxu1 }
 0x6aa   : > { %v1571_v54 = vpack.c.bf16 %v1383_v52, %v1380_v51 }
 0x6ac   : > { %1572 = vst [vmem:[%s356_s28] sm:$0xff] %v1571_v54  }
 0x6ad   : > { %1882 = shalt.err (!%p1879_p3)
}
 0x6ae   : > { %s1883_s21 = scalar_lea.hbm %s2260_s22, 128  ;;  %s1887_s14 = scalar_lea.hbm %s2311_s9, 256 }
 0x6af   : > { %p1884_p2 = scmp.ne.s32.totalorder %s2260_s22, %s1883_s21  ;;  %p1888_p7 = scmp.lt.s32.totalorder %s2260_s22, %s2311_s9 }
 0x6b0   : > { %p1889_p6 = scmp.lt.s32.totalorder %s1887_s14, %s1883_s21 }
 0x6b1   : > { %p1885_p4 = pnand %p1884_p2, %p2036_p5 }
 0x6b2   : > { %p1890_p9 = por %p1889_p6, %p1888_p7 }
 0x6b3   : > { %p1886_p13 = pneg %p1885_p4 }
 0x6b5   : > { %p1891_p10 = pnand %p1890_p9, %p1886_p13 }
 0x6b7   : > { %1894 = shalt.err (!%p1891_p10)
}
 0x6b8   : > { %s1946_s23 = smov 64   ;;  %s1947_s13 = smov 4  }
 0x6b9   : > { %1732 = dma.vmem_to_hbm [thread:$0]  (%p2036_p5), %s2255_s29, 128, %s2260_s22, %s2262_s25, %s1946_s23, %s1946_s23, %s1947_s13  }
 0x6ba PF: > { %p1749_p12 = scmp.ge.s32.totalorder %s1937_s12, 2  ;;  %s1425_s24 = sand.u32 1, %s1925_s30  }
 0x6bb   : > { %p2321_p8 = scmp.ne.s32.totalorder %s2314_s20, 0  ;;  %s1426_s26 = scalar_lea.sflag [#allocation4], %s1425_s24 }
 0x6bd   : > { %p1742_p11 = pnand %p1749_p12, %p2321_p8 }
 0x6bf   : > { %p1743_p0 = pneg %p1742_p11 }
 0x6c1   : > { %1920 = dma.done.wait (%p1743_p0), %s1426_s26, 128  }
 0x6c2   : > { %1922 = vsyncadd (%p1743_p0), %s1426_s26, 4294967168  ;;  %p21_p1 = scmp.ge.s32.totalorder %s2023_s15, 4   ;;  %s2322_s30 = smov %s1929_s10 }
 0x6c3   : > { %s2323_s10 = smov %s1933_s11  ;;  %s2324_s11 = smov %s2034_s18 }
 0x6c4   : > { %s2325_s12 = smov %s2023_s15  ;;  %23 = sbr.rel (!%p21_p1) target bundleno = 5 (0x5), region = 114 }
 0x6c9   :  { %1431 = vsyncpa [#allocation3], 1 }
 0x6ca   :  { %1433 = vsyncpa [#allocation3 + $0x1], 1 }
 0x6cb   :  { %1434 = vsyncpa [#allocation6], 1 }
 0x6cc   :  { %1435 = vsyncpa [#allocation4], 1 }
 0x6cd   :  { %1437 = vsyncpa [#allocation4 + $0x1], 1 }

</bundles_post_ra>
